<compile_context>
chip_gen: v7x
topology: tpu7x:2x2x1
jax: 0.10.0
libtpu: 0.0.40
codegen_flags: <defaults>
</compile_context>

<pallas_src>
import functools

import jax
import jax.numpy as jnp
from jax import lax
from jax.experimental import pallas as pl
from jax.experimental.pallas import tpu as pltpu

LN_EPS = 1e-5                 # nn.LayerNorm default
_INV_SQRT2 = 0.7071067811865476


def _round_up(x, m):
    return ((x + m - 1) // m) * m


def _layernorm(x, gamma, beta, inv_c, mask=None):
    """LayerNorm over the last dim; `inv_c` = 1/true_channels, `mask` zeros padded lanes."""
    mu = jnp.sum(x, axis=-1, keepdims=True) * inv_c
    d = x - mu
    if mask is not None:
        d = d * mask                                  # pad lanes contribute 0 to var and output
    var = jnp.sum(d * d, axis=-1, keepdims=True) * inv_c
    return d * lax.rsqrt(var + LN_EPS) * gamma + beta


def _gelu_exact(x):
    # nn.GELU() default = exact erf-based GELU
    return 0.5 * x * (1.0 + lax.erf(x * jnp.float32(_INV_SQRT2)))


def conv_bloc1d_kernel(x_ref, w1_ref, w2_ref, ln_ref, o_ref, *,
                       c_valid, c_pad, matmul_dtype):
    x = x_ref[...].astype(jnp.float32)

    if c_valid < c_pad:
        lane = lax.broadcasted_iota(jnp.int32, (1, c_pad), 1)
        mask = (lane < c_valid).astype(jnp.float32)
    else:
        mask = None
    inv_c = jnp.float32(1.0 / c_valid)

    g0, b0 = ln_ref[0:1, :], ln_ref[1:2, :]
    g1, b1 = ln_ref[2:3, :], ln_ref[3:4, :]
    g2, b2 = ln_ref[4:5, :], ln_ref[5:6, :]

    nodes = _layernorm(x, g0, b0, inv_c, mask)

    # conv1 (Linear, no bias): nodes @ W1 (weights pre-transposed to (in, out)); bf16 in, f32 acc.
    h = jnp.dot(nodes.astype(matmul_dtype), w1_ref[...],
                preferred_element_type=jnp.float32)
    h = _gelu_exact(_layernorm(h, g1, b1, inv_c, mask))
    nodes = nodes + h

    # conv2
    h = jnp.dot(nodes.astype(matmul_dtype), w2_ref[...],
                preferred_element_type=jnp.float32)
    h = _gelu_exact(_layernorm(h, g2, b2, inv_c, mask))
    nodes = nodes + h

    o_ref[...] = nodes.astype(o_ref.dtype)


def _choose_tile_m(m_rows, c_pad, w_bytes, *, budget_bytes=40 << 20, cap=512):
    # ~10 live f32 (tile_m, Cp) slabs: double-buffered in/out tiles + compute temporaries.
    per_row = 10 * c_pad * 4
    fixed = 2 * 2 * c_pad * c_pad * w_bytes + 2 * 8 * c_pad * 4   # double-buffered weights+params
    avail = max(budget_bytes - fixed, 8 * per_row)
    tile = min(cap, avail // per_row, _round_up(m_rows, 8))
    return max(8, (tile // 8) * 8)


def conv_bloc1d(nodes, params, *, tile_m=None, matmul_dtype=jnp.bfloat16):
    """nodes: (B, N, C). Returns (B, N, C); residual requires in_channels == out_channels."""
    B, N, C = nodes.shape
    w1, w2, g0, b0, g1, b1, g2, b2 = params
    assert w1.shape == (C, C) and w2.shape == (C, C)

    Cp = _round_up(C, 128)                       # lane-dense channel dim
    M = B * N
    w_bytes = jnp.dtype(matmul_dtype).itemsize

    if tile_m is None:
        tile_m = _choose_tile_m(M, Cp, w_bytes)
    tile_m = max(8, (min(tile_m, _round_up(M, 8)) // 8) * 8)
    Mp = _round_up(M, tile_m)                    # padded row count (handles non-divisible M)

    x2d = jnp.pad(nodes.reshape(M, C), ((0, Mp - M), (0, Cp - C)))

    def pad_w(w):                                # zero padding keeps padded output lanes exactly 0
        return jnp.pad(w, ((0, Cp - C), (0, Cp - C))).astype(matmul_dtype)

    w1p, w2p = pad_w(w1), pad_w(w2)

    # Stack the six LayerNorm params into one (8, Cp) block (rows 6,7 unused zero padding).
    ln = jnp.stack([p.reshape(-1).astype(jnp.float32) for p in (g0, b0, g1, b1, g2, b2)]
                   + [jnp.zeros((C,), jnp.float32)] * 2)
    ln = jnp.pad(ln, ((0, 0), (0, Cp - C)))

    grid = (Mp // tile_m,)
    row_spec = pl.BlockSpec((tile_m, Cp), lambda i: (i, 0))
    # Grid-invariant specs (same block index every step) are DMA'd once by the pipeline.
    # TODO(synk): try pipeline_mode=pl.Buffered(1) on these to drop the second buffer once
    # verified on the target jax version; the VMEM budget already accounts for 2 buffers.
    w_spec = pl.BlockSpec((Cp, Cp), lambda i: (0, 0))
    ln_spec = pl.BlockSpec((8, Cp), lambda i: (0, 0))

    kernel = functools.partial(conv_bloc1d_kernel, c_valid=C, c_pad=Cp,
                               matmul_dtype=matmul_dtype)

    est_vmem = 10 * tile_m * Cp * 4 + 4 * Cp * Cp * w_bytes + 2 * 8 * Cp * 4
    vmem_limit = int(min(max(est_vmem + (8 << 20), 32 << 20), 48 << 20))

    cost = pl.CostEstimate(
        flops=4 * Mp * Cp * Cp,                              # two (tile,Cp) x (Cp,Cp) matmuls
        transcendentals=2 * Mp * Cp,                         # two erf GELUs per element
        bytes_accessed=2 * Mp * Cp * 4 + 2 * Cp * Cp * w_bytes + 8 * Cp * 4,
    )

    out = pl.pallas_call(
        kernel,
        out_shape=jax.ShapeDtypeStruct((Mp, Cp), nodes.dtype),
        grid_spec=pltpu.PrefetchScalarGridSpec(
            num_scalar_prefetch=0,
            grid=grid,
            in_specs=[row_spec, w_spec, w_spec, ln_spec],
            out_specs=row_spec,
        ),
        compiler_params=pltpu.CompilerParams(
            dimension_semantics=("parallel",),
            vmem_limit_bytes=vmem_limit,
        ),
        cost_estimate=cost,
    )(x2d, w1p, w2p, ln)

    return out[:M, :C].reshape(B, N, C)


def init_params(key, in_channels, out_channels):
    """Deterministic init matching the PyTorch module's __init__."""
    k1, k2 = jax.random.split(key)
    # xavier_uniform (glorot): U(-a, a), a = sqrt(6 / (fan_in + fan_out))
    a1 = jnp.sqrt(6.0 / (in_channels + out_channels))
    a2 = jnp.sqrt(6.0 / (out_channels + out_channels))
    # nn.Linear weight is (out, in); pre-transpose to (in, out) so the kernel computes x @ W^T.
    w1 = jax.random.uniform(k1, (out_channels, in_channels), jnp.float32, -a1, a1).T
    w2 = jax.random.uniform(k2, (out_channels, out_channels), jnp.float32, -a2, a2).T
    # LayerNorm default affine params: weight=1, bias=0 (kept as explicit params).
    g0 = jnp.ones((1, in_channels), jnp.float32)
    b0 = jnp.zeros((1, in_channels), jnp.float32)
    g1 = jnp.ones((1, out_channels), jnp.float32)
    b1 = jnp.zeros((1, out_channels), jnp.float32)
    g2 = jnp.ones((1, out_channels), jnp.float32)
    b2 = jnp.zeros((1, out_channels), jnp.float32)
    return (w1, w2, g0, b0, g1, b1, g2, b2)


def conv_bloc1d_reference(nodes, params, matmul_dtype=None):
    """Plain-JAX reference mirroring the PyTorch forward (optionally same MXU dtype policy)."""
    w1, w2, g0, b0, g1, b1, g2, b2 = params
    C = nodes.shape[-1]
    inv_c = jnp.float32(1.0 / C)

    def dot(a, w):
        if matmul_dtype is not None:
            a = a.astype(matmul_dtype)
            w = w.astype(matmul_dtype)
        return jnp.dot(a, w, preferred_element_type=jnp.float32)

    nodes = _layernorm(nodes.astype(jnp.float32), g0.reshape(-1), b0.reshape(-1), inv_c)
    x = dot(nodes, w1)
    x = _gelu_exact(_layernorm(x, g1.reshape(-1), b1.reshape(-1), inv_c))
    nodes = nodes + x
    x = dot(nodes, w2)
    x = _gelu_exact(_layernorm(x, g2.reshape(-1), b2.reshape(-1), inv_c))
    return nodes + x


if __name__ == "__main__":
    key = jax.random.PRNGKey(0)
    k_x, k_p, k_x2 = jax.random.split(key, 3)

    # Primary case: (batch, sequence length, channels); in_channels == out_channels == C.
    B, N, C = 2, 16, 32
    nodes = jax.random.normal(k_x, (B, N, C), jnp.float32)
    params = init_params(k_p, C, C)

    out = jax.block_until_ready(conv_bloc1d(nodes, params))
    assert out.shape == (B, N, C)

    # Matched-precision reference (bf16 matmul operands, f32 elsewhere) -> tight tolerance.
    ref_matched = conv_bloc1d_reference(nodes, params, matmul_dtype=jnp.bfloat16)
    assert jnp.allclose(out, ref_matched, atol=2e-3, rtol=2e-3)

    # Full-f32 reference (PyTorch module semantics); bf16 MXU operands -> looser tolerance.
    ref_f32 = conv_bloc1d_reference(nodes, params)
    assert jnp.allclose(out, ref_f32, atol=5e-2, rtol=5e-2)

    # Second case: row count not divisible by 8 to exercise row padding.
    nodes2 = jax.random.normal(k_x2, (3, 7, C), jnp.float32)
    out2 = jax.block_until_ready(conv_bloc1d(nodes2, params))
    ref2 = conv_bloc1d_reference(nodes2, params, matmul_dtype=jnp.bfloat16)
    assert out2.shape == (3, 7, C)
    assert jnp.allclose(out2, ref2, atol=2e-3, rtol=2e-3)

    print("KERNEL_OK")
</pallas_src>

<mosaic_0001>
module attributes {stable_mosaic.version = 11 : i64} {
  func.func @conv_bloc1d_kernel(%arg0: i32, %arg1: memref<32x128xf32, #tpu.memory_space<vmem>>, %arg2: memref<128x128xbf16, #tpu.memory_space<vmem>>, %arg3: memref<128x128xbf16, #tpu.memory_space<vmem>>, %arg4: memref<8x128xf32, #tpu.memory_space<vmem>>, %arg5: memref<32x128xf32, #tpu.memory_space<vmem>>) attributes {dimension_semantics = [#tpu.dimension_semantics<parallel>], iteration_bounds = array<i64: 1>, scalar_prefetch = 0 : i64, scratch_operands = 0 : i64, tpu.core_type = #tpu.core_type<tc>, window_params = [{transform_indices = @transform_0, window_bounds = array<i64: 32, 128>}, {pipeline_mode = #tpu.pipeline_mode<synchronous>, transform_indices = @transform_1, window_bounds = array<i64: 128, 128>}, {pipeline_mode = #tpu.pipeline_mode<synchronous>, transform_indices = @transform_2, window_bounds = array<i64: 128, 128>}, {pipeline_mode = #tpu.pipeline_mode<synchronous>, transform_indices = @transform_3, window_bounds = array<i64: 8, 128>}, {transform_indices = @transform_4, window_bounds = array<i64: 32, 128>}]} {
    %c0 = arith.constant 0 : index
    %c0_0 = arith.constant 0 : index
    %0 = vector.load %arg1[%c0, %c0_0] : memref<32x128xf32, #tpu.memory_space<vmem>>, vector<32x128xf32>
    %1 = tpu.iota {dimensions = array<i32: 1>} : vector<1x128xi32>
    %c32_i32 = arith.constant 32 : i32
    %2 = vector.broadcast %c32_i32 : i32 to vector<1x128xi32>
    %3 = arith.cmpi slt, %1, %2 : vector<1x128xi32>
    %4 = arith.extui %3 : vector<1x128xi1> to vector<1x128xi32>
    %5 = arith.sitofp %4 : vector<1x128xi32> to vector<1x128xf32>
    %c0_1 = arith.constant 0 : index
    %c0_2 = arith.constant 0 : index
    %6 = vector.load %arg4[%c0_1, %c0_2] : memref<8x128xf32, #tpu.memory_space<vmem>>, vector<1x128xf32>
    %c1 = arith.constant 1 : index
    %c0_3 = arith.constant 0 : index
    %7 = vector.load %arg4[%c1, %c0_3] : memref<8x128xf32, #tpu.memory_space<vmem>>, vector<1x128xf32>
    %c2 = arith.constant 2 : index
    %c0_4 = arith.constant 0 : index
    %8 = vector.load %arg4[%c2, %c0_4] : memref<8x128xf32, #tpu.memory_space<vmem>>, vector<1x128xf32>
    %c3 = arith.constant 3 : index
    %c0_5 = arith.constant 0 : index
    %9 = vector.load %arg4[%c3, %c0_5] : memref<8x128xf32, #tpu.memory_space<vmem>>, vector<1x128xf32>
    %c4 = arith.constant 4 : index
    %c0_6 = arith.constant 0 : index
    %10 = vector.load %arg4[%c4, %c0_6] : memref<8x128xf32, #tpu.memory_space<vmem>>, vector<1x128xf32>
    %c5 = arith.constant 5 : index
    %c0_7 = arith.constant 0 : index
    %11 = vector.load %arg4[%c5, %c0_7] : memref<8x128xf32, #tpu.memory_space<vmem>>, vector<1x128xf32>
    %cst = arith.constant dense<0.000000e+00> : vector<32xf32>
    %12 = vector.multi_reduction <add>, %0, %cst [1] : vector<32x128xf32> to vector<32xf32>
    %13 = vector.shape_cast %12 : vector<32xf32> to vector<32x1xf32>
    %cst_8 = arith.constant 3.125000e-02 : f32
    %14 = vector.broadcast %cst_8 : f32 to vector<32x1xf32>
    %15 = arith.mulf %13, %14 : vector<32x1xf32>
    %16 = vector.broadcast %15 : vector<32x1xf32> to vector<32x128xf32>
    %17 = arith.subf %0, %16 : vector<32x128xf32>
    %18 = vector.broadcast %5 : vector<1x128xf32> to vector<32x128xf32>
    %19 = arith.mulf %17, %18 : vector<32x128xf32>
    %20 = arith.mulf %19, %19 : vector<32x128xf32>
    %cst_9 = arith.constant dense<0.000000e+00> : vector<32xf32>
    %21 = vector.multi_reduction <add>, %20, %cst_9 [1] : vector<32x128xf32> to vector<32xf32>
    %22 = vector.shape_cast %21 : vector<32xf32> to vector<32x1xf32>
    %cst_10 = arith.constant 3.125000e-02 : f32
    %23 = vector.broadcast %cst_10 : f32 to vector<32x1xf32>
    %24 = arith.mulf %22, %23 : vector<32x1xf32>
    %cst_11 = arith.constant 9.99999974E-6 : f32
    %25 = vector.broadcast %cst_11 : f32 to vector<32x1xf32>
    %26 = arith.addf %24, %25 : vector<32x1xf32>
    %27 = math.rsqrt %26 : vector<32x1xf32>
    %28 = vector.broadcast %27 : vector<32x1xf32> to vector<32x128xf32>
    %29 = arith.mulf %19, %28 : vector<32x128xf32>
    %30 = vector.broadcast %6 : vector<1x128xf32> to vector<32x128xf32>
    %31 = arith.mulf %29, %30 : vector<32x128xf32>
    %32 = vector.broadcast %7 : vector<1x128xf32> to vector<32x128xf32>
    %33 = arith.addf %31, %32 : vector<32x128xf32>
    %34 = arith.truncf %33 : vector<32x128xf32> to vector<32x128xbf16>
    %c0_12 = arith.constant 0 : index
    %c0_13 = arith.constant 0 : index
    %35 = vector.load %arg2[%c0_12, %c0_13] : memref<128x128xbf16, #tpu.memory_space<vmem>>, vector<128x128xbf16>
    %cst_14 = arith.constant dense<0.000000e+00> : vector<32x128xf32>
    %36 = tpu.matmul %34, %35, %cst_14 {dimension_numbers = #tpu.dot_dimension_numbers<[1], [0], [0], [1], [0, 0, 1, 1], [], []>} : vector<32x128xbf16>, vector<128x128xbf16>, vector<32x128xf32> -> vector<32x128xf32>
    %cst_15 = arith.constant dense<0.000000e+00> : vector<32xf32>
    %37 = vector.multi_reduction <add>, %36, %cst_15 [1] : vector<32x128xf32> to vector<32xf32>
    %38 = vector.shape_cast %37 : vector<32xf32> to vector<32x1xf32>
    %cst_16 = arith.constant 3.125000e-02 : f32
    %39 = vector.broadcast %cst_16 : f32 to vector<32x1xf32>
    %40 = arith.mulf %38, %39 : vector<32x1xf32>
    %41 = vector.broadcast %40 : vector<32x1xf32> to vector<32x128xf32>
    %42 = arith.subf %36, %41 : vector<32x128xf32>
    %43 = vector.broadcast %5 : vector<1x128xf32> to vector<32x128xf32>
    %44 = arith.mulf %42, %43 : vector<32x128xf32>
    %45 = arith.mulf %44, %44 : vector<32x128xf32>
    %cst_17 = arith.constant dense<0.000000e+00> : vector<32xf32>
    %46 = vector.multi_reduction <add>, %45, %cst_17 [1] : vector<32x128xf32> to vector<32xf32>
    %47 = vector.shape_cast %46 : vector<32xf32> to vector<32x1xf32>
    %cst_18 = arith.constant 3.125000e-02 : f32
    %48 = vector.broadcast %cst_18 : f32 to vector<32x1xf32>
    %49 = arith.mulf %47, %48 : vector<32x1xf32>
    %cst_19 = arith.constant 9.99999974E-6 : f32
    %50 = vector.broadcast %cst_19 : f32 to vector<32x1xf32>
    %51 = arith.addf %49, %50 : vector<32x1xf32>
    %52 = math.rsqrt %51 : vector<32x1xf32>
    %53 = vector.broadcast %52 : vector<32x1xf32> to vector<32x128xf32>
    %54 = arith.mulf %44, %53 : vector<32x128xf32>
    %55 = vector.broadcast %8 : vector<1x128xf32> to vector<32x128xf32>
    %56 = arith.mulf %54, %55 : vector<32x128xf32>
    %57 = vector.broadcast %9 : vector<1x128xf32> to vector<32x128xf32>
    %58 = arith.addf %56, %57 : vector<32x128xf32>
    %cst_20 = arith.constant 5.000000e-01 : f32
    %59 = vector.broadcast %cst_20 : f32 to vector<32x128xf32>
    %60 = arith.mulf %59, %58 : vector<32x128xf32>
    %cst_21 = arith.constant 0.707106769 : f32
    %61 = vector.broadcast %cst_21 : f32 to vector<32x128xf32>
    %62 = arith.mulf %58, %61 : vector<32x128xf32>
    %63 = math.erf %62 : vector<32x128xf32>
    %cst_22 = arith.constant 1.000000e+00 : f32
    %64 = vector.broadcast %cst_22 : f32 to vector<32x128xf32>
    %65 = arith.addf %64, %63 : vector<32x128xf32>
    %66 = arith.mulf %60, %65 : vector<32x128xf32>
    %67 = arith.addf %33, %66 : vector<32x128xf32>
    %68 = arith.truncf %67 : vector<32x128xf32> to vector<32x128xbf16>
    %c0_23 = arith.constant 0 : index
    %c0_24 = arith.constant 0 : index
    %69 = vector.load %arg3[%c0_23, %c0_24] : memref<128x128xbf16, #tpu.memory_space<vmem>>, vector<128x128xbf16>
    %cst_25 = arith.constant dense<0.000000e+00> : vector<32x128xf32>
    %70 = tpu.matmul %68, %69, %cst_25 {dimension_numbers = #tpu.dot_dimension_numbers<[1], [0], [0], [1], [0, 0, 1, 1], [], []>} : vector<32x128xbf16>, vector<128x128xbf16>, vector<32x128xf32> -> vector<32x128xf32>
    %cst_26 = arith.constant dense<0.000000e+00> : vector<32xf32>
    %71 = vector.multi_reduction <add>, %70, %cst_26 [1] : vector<32x128xf32> to vector<32xf32>
    %72 = vector.shape_cast %71 : vector<32xf32> to vector<32x1xf32>
    %cst_27 = arith.constant 3.125000e-02 : f32
    %73 = vector.broadcast %cst_27 : f32 to vector<32x1xf32>
    %74 = arith.mulf %72, %73 : vector<32x1xf32>
    %75 = vector.broadcast %74 : vector<32x1xf32> to vector<32x128xf32>
    %76 = arith.subf %70, %75 : vector<32x128xf32>
    %77 = vector.broadcast %5 : vector<1x128xf32> to vector<32x128xf32>
    %78 = arith.mulf %76, %77 : vector<32x128xf32>
    %79 = arith.mulf %78, %78 : vector<32x128xf32>
    %cst_28 = arith.constant dense<0.000000e+00> : vector<32xf32>
    %80 = vector.multi_reduction <add>, %79, %cst_28 [1] : vector<32x128xf32> to vector<32xf32>
    %81 = vector.shape_cast %80 : vector<32xf32> to vector<32x1xf32>
    %cst_29 = arith.constant 3.125000e-02 : f32
    %82 = vector.broadcast %cst_29 : f32 to vector<32x1xf32>
    %83 = arith.mulf %81, %82 : vector<32x1xf32>
    %cst_30 = arith.constant 9.99999974E-6 : f32
    %84 = vector.broadcast %cst_30 : f32 to vector<32x1xf32>
    %85 = arith.addf %83, %84 : vector<32x1xf32>
    %86 = math.rsqrt %85 : vector<32x1xf32>
    %87 = vector.broadcast %86 : vector<32x1xf32> to vector<32x128xf32>
    %88 = arith.mulf %78, %87 : vector<32x128xf32>
    %89 = vector.broadcast %10 : vector<1x128xf32> to vector<32x128xf32>
    %90 = arith.mulf %88, %89 : vector<32x128xf32>
    %91 = vector.broadcast %11 : vector<1x128xf32> to vector<32x128xf32>
    %92 = arith.addf %90, %91 : vector<32x128xf32>
    %cst_31 = arith.constant 5.000000e-01 : f32
    %93 = vector.broadcast %cst_31 : f32 to vector<32x128xf32>
    %94 = arith.mulf %93, %92 : vector<32x128xf32>
    %cst_32 = arith.constant 0.707106769 : f32
    %95 = vector.broadcast %cst_32 : f32 to vector<32x128xf32>
    %96 = arith.mulf %92, %95 : vector<32x128xf32>
    %97 = math.erf %96 : vector<32x128xf32>
    %cst_33 = arith.constant 1.000000e+00 : f32
    %98 = vector.broadcast %cst_33 : f32 to vector<32x128xf32>
    %99 = arith.addf %98, %97 : vector<32x128xf32>
    %100 = arith.mulf %94, %99 : vector<32x128xf32>
    %101 = arith.addf %67, %100 : vector<32x128xf32>
    %c0_34 = arith.constant 0 : index
    %c0_35 = arith.constant 0 : index
    %102 = vector.load %arg5[%c0_34, %c0_35] : memref<32x128xf32, #tpu.memory_space<vmem>>, vector<32x128xf32>
    tpu.vector_store %arg5[%c0_34, %c0_35], %101 {strides = array<i32>} : memref<32x128xf32, #tpu.memory_space<vmem>>, vector<32x128xf32>,
    return
  }
  func.func @transform_0(%arg0: i32) -> (i32, i32) {
    %c0_i32 = arith.constant 0 : i32
    %c0_i32_0 = arith.constant 0 : i32
    return %arg0, %c0_i32 : i32, i32
  }
  func.func @transform_1(%arg0: i32) -> (i32, i32) {
    %c0_i32 = arith.constant 0 : i32
    %c0_i32_0 = arith.constant 0 : i32
    %c0_i32_1 = arith.constant 0 : i32
    return %c0_i32, %c0_i32_0 : i32, i32
  }
  func.func @transform_2(%arg0: i32) -> (i32, i32) {
    %c0_i32 = arith.constant 0 : i32
    %c0_i32_0 = arith.constant 0 : i32
    %c0_i32_1 = arith.constant 0 : i32
    return %c0_i32, %c0_i32_0 : i32, i32
  }
  func.func @transform_3(%arg0: i32) -> (i32, i32) {
    %c0_i32 = arith.constant 0 : i32
    %c0_i32_0 = arith.constant 0 : i32
    %c0_i32_1 = arith.constant 0 : i32
    return %c0_i32, %c0_i32_0 : i32, i32
  }
  func.func @transform_4(%arg0: i32) -> (i32, i32) {
    %c0_i32 = arith.constant 0 : i32
    %c0_i32_0 = arith.constant 0 : i32
    return %arg0, %c0_i32 : i32, i32
  }
}

</mosaic_0001>

<bundles_post_ra>
// kernel: tpu_custom_call.1
= control target key start
LH: loop header
LB: loop body
LE: loop exit
PB: predicated region body
PF: predicated region fallthrough
CT: control target
= control target key end

     0   :  { %9 = vsyncpa [#allocation3], 0  ;;  %s967_s0 = inlined_call_operand.hbm [shape: f32[32,128], index: 0, kind: input, shape index: {}]   ;;  %s968_s1 = inlined_call_operand.hbm [shape: bf16[128,128], index: 1, kind: input, shape index: {}]   ;;  %s969_s2 = inlined_call_operand.hbm [shape: bf16[128,128], index: 2, kind: input, shape index: {}]   ;;  %s970_s3 = inlined_call_operand.vmem [shape: f32[8,128], index: 3, kind: input, shape index: {}]   ;;  %s971_s4 = inlined_call_operand.hbm [shape: f32[32,128], index: 4, kind: output, shape index: {}]  }
   0x1   :  { %10 = vsyncpa [#allocation6], 0 }
   0x2   :  { %11 = vsyncpa [#allocation4], 0  ;;  %s809_s15 = smov [#allocation5]   ;;  %s715_s19 = scalar_lea.hbm %s968_s1, 1024 }
   0x3   :  { %s29_s16 = sshll.u32 %s809_s15, 4  ;;  %p716_p0 = scmp.ne.s32.totalorder %s968_s1, %s715_s19  ;;  %s30_s16 = int_to_ptr.vmem [resolvable:$true] %s29_s16 }
   0x4   :  { %p719_p1 = scmp.lt.u32.totalorder %s715_s19, %s968_s1 }
   0x6   :  { %p721_p2 = pnand %p719_p1, %p716_p0 }
   0x8   :  { %724 = shalt.err (!%p721_p2)
}
   0x9   :  { %s725_s24 = scalar_lea.vmem %s30_s16, 1024  ;;  %p730_p4 = scmp.lt.s32.totalorder %s30_s16, %s30_s16 }
   0xa   :  { %p726_p3 = scmp.ne.s32.totalorder %s30_s16, %s725_s24  ;;  %p731_p5 = scmp.lt.s32.totalorder %s725_s24, %s725_s24 }
   0xc   :  { %p732_p6 = por %p731_p5, %p730_p4 }
   0xe   :  { %p733_p7 = pnand %p732_p6, %p726_p3 }
  0x10   :  { %736 = shalt.err (!%p733_p7)
}
  0x11   :  { %s810_s25 = smov 64   ;;  %s811_s26 = smov 4  }
  0x12   :  { %35 = dma.hbm_to_vmem [thread:$0]  %s968_s1, 1024, %s30_s16, [#allocation6], %s810_s25, %s810_s25, %s811_s26  }
  0x13   :  { %s812_s29 = smov [#allocation2]   ;;  %s737_s7 = scalar_lea.hbm %s967_s0, 512 }
  0x14   :  { %s17_s30 = sshll.u32 %s812_s29, 4  ;;  %p738_p8 = scmp.ne.s32.totalorder %s967_s0, %s737_s7  ;;  %s18_s30 = int_to_ptr.vmem [resolvable:$true] %s17_s30 }
  0x15   :  { %p741_p9 = scmp.lt.u32.totalorder %s737_s7, %s967_s0 }
  0x17   :  { %p743_p10 = pnand %p741_p9, %p738_p8 }
  0x19   :  { %746 = shalt.err (!%p743_p10)
}
  0x1a   :  { %s747_s12 = scalar_lea.vmem %s18_s30, 512  ;;  %p752_p12 = scmp.lt.s32.totalorder %s18_s30, %s18_s30 }
  0x1b   :  { %p748_p11 = scmp.ne.s32.totalorder %s18_s30, %s747_s12  ;;  %p753_p13 = scmp.lt.s32.totalorder %s747_s12, %s747_s12 }
  0x1d   :  { %p754_p0 = por %p753_p13, %p752_p12 }
  0x1f   :  { %p755_p1 = pnand %p754_p0, %p748_p11 }
  0x21   :  { %758 = shalt.err (!%p755_p1)
}
  0x22   :  { %s813_s1 = smov 128   ;;  %s814_s13 = smov 8  }
  0x23   :  { %23 = dma.hbm_to_vmem [thread:$0]  %s967_s0, 512, %s18_s30, [#allocation3], %s813_s1, %s813_s1, %s814_s13  }
  0x24   :  { %s815_s16 = smov [#allocation7]   ;;  %s759_s20 = scalar_lea.hbm %s969_s2, 1024 }
  0x25   :  { %s41_s17 = sshll.u32 %s815_s16, 4  ;;  %p760_p2 = scmp.ne.s32.totalorder %s969_s2, %s759_s20  ;;  %s42_s17 = int_to_ptr.vmem [resolvable:$true] %s41_s17 }
  0x26   :  { %p763_p3 = scmp.lt.u32.totalorder %s759_s20, %s969_s2 }
  0x28   :  { %p765_p4 = pnand %p763_p3, %p760_p2 }
  0x2a   :  { %768 = shalt.err (!%p765_p4)
}
  0x2b   :  { %s769_s27 = scalar_lea.vmem %s42_s17, 1024  ;;  %p774_p6 = scmp.lt.s32.totalorder %s42_s17, %s42_s17 }
  0x2c   :  { %p770_p5 = scmp.ne.s32.totalorder %s42_s17, %s769_s27  ;;  %p775_p7 = scmp.lt.s32.totalorder %s769_s27, %s769_s27 }
  0x2e   :  { %p776_p8 = por %p775_p7, %p774_p6 }
  0x30   :  { %p777_p9 = pnand %p776_p8, %p770_p5 }
  0x32   :  { %780 = shalt.err (!%p777_p9)
}
  0x33   :  { %47 = dma.hbm_to_vmem [thread:$0]  %s969_s2, 1024, %s42_s17, [#allocation6], %s810_s25, %s810_s25, %s811_s26  }
  0x34   :  { %803 = dma.done.wait [#allocation3], 512  }
  0x35   :  { %804 = vsyncadd [#allocation3], 4294966784 }
  0x36   :  { %805 = dma.done.wait [#allocation6], 2048  }
  0x37   :  { %806 = vsyncadd [#allocation6], 4294965248  ;;  %v60_v0 = vld [vmem:[#allocation2] sm:$0xff]  ;;  %v62_v1 = vld [vmem:[#allocation2 + $0x10] sm:$0xff]  ;;  %v64_v5 = vlaneseq  ;;  %v816_v11 = vmov 0.0  }
  0x38   :  { %v61_v2 = vld [vmem:[#allocation2 + $0x8] sm:$0xff]  ;;  %75 = vadd.xlane.f32.xlu0 %v60_v0  ;;  %79 = vadd.xlane.f32.xlu1 %v62_v1  ;;  %v63_v3 = vld [vmem:[#allocation2 + $0x18] sm:$0xff]  ;;  %v659_v4 = vld [vmem:[#allocation5] sm:$0xff]  }
  0x39   :  { %610 = vmatprep.subr.bf16.mxu0 %v659_v4  ;;  %v65_v6 = vand.u32 127, %v64_v5  ;;  %v660_v29 = vld [vmem:[#allocation5 + $0x8] sm:$0xff]   ;;  %v661_v30 = vld [vmem:[#allocation5 + $0x10] sm:$0xff]   ;;  %v662_v31 = vld [vmem:[#allocation5 + $0x18] sm:$0xff]  }
  0x3a   :  { %611 = vmatpush3.bf16.msra.mxu0 %v659_v4  ;;  %v663_v32 = vld [vmem:[#allocation5 + $0x20] sm:$0xff]   ;;  %v664_v33 = vld [vmem:[#allocation5 + $0x28] sm:$0xff]   ;;  %v665_v34 = vld [vmem:[#allocation5 + $0x30] sm:$0xff]  }
  0x3b   :  { %vm66_vm0 = vcmp.lt.s32.totalorder %v65_v6, 32  ;;  %612 = vmatprep.subr.bf16.mxu0 %v660_v29  ;;  %v666_v35 = vld [vmem:[#allocation5 + $0x38] sm:$0xff]   ;;  %v568_v50 = vld [vmem:[%s970_s3] ss:$0 sm:$0xff]  ;;  %v569_v55 = vld [vmem:[%s970_s3 + $0x1] ss:$0 sm:$0xff] }
  0x3c   :  { %77 = vadd.xlane.f32.xlu0 %v61_v2  ;;  %81 = vadd.xlane.f32.xlu1 %v63_v3  ;;  %v888_v12 = vsel %vm66_vm0, 1.0, %v816_v11 }
  0x3e   :  { %613 = vmatpush3.bf16.msra.mxu0 %v660_v29  ;;  %v667_v29 = vld [vmem:[#allocation7] sm:$0xff]  }
  0x3f   :  { %614 = vmatprep.subr.bf16.mxu0 %v661_v30  ;;  %630 = vmatprep.subr.bf16.mxu1 %v667_v29 }
  0x40   :  { %631 = vmatpush3.bf16.msra.mxu1 %v667_v29 }
  0x42   :  { %615 = vmatpush3.bf16.msra.mxu0 %v661_v30  ;;  %v668_v30 = vld [vmem:[#allocation7 + $0x8] sm:$0xff]  }
  0x43   :  { %616 = vmatprep.subr.bf16.mxu0 %v662_v31  ;;  %632 = vmatprep.subr.bf16.mxu1 %v668_v30 }
  0x44   :  { %633 = vmatpush3.bf16.msra.mxu1 %v668_v30 }
  0x46   :  { %617 = vmatpush3.bf16.msra.mxu0 %v662_v31  ;;  %v669_v31 = vld [vmem:[#allocation7 + $0x10] sm:$0xff]  }
  0x47   :  { %618 = vmatprep.subr.bf16.mxu0 %v663_v32  ;;  %634 = vmatprep.subr.bf16.mxu1 %v669_v31 }
  0x48   :  { %635 = vmatpush3.bf16.msra.mxu1 %v669_v31 }
  0x4a   :  { %619 = vmatpush3.bf16.msra.mxu0 %v663_v32  ;;  %v670_v32 = vld [vmem:[#allocation7 + $0x18] sm:$0xff]  }
  0x4b   :  { %620 = vmatprep.subr.bf16.mxu0 %v664_v33  ;;  %636 = vmatprep.subr.bf16.mxu1 %v670_v32 }
  0x4c   :  { %637 = vmatpush3.bf16.msra.mxu1 %v670_v32 }
  0x4e   :  { %621 = vmatpush3.bf16.msra.mxu0 %v664_v33  ;;  %v671_v33 = vld [vmem:[#allocation7 + $0x20] sm:$0xff]  }
  0x4f   :  { %622 = vmatprep.subr.bf16.mxu0 %v665_v34  ;;  %638 = vmatprep.subr.bf16.mxu1 %v671_v33 }
  0x50   :  { %639 = vmatpush3.bf16.msra.mxu1 %v671_v33 }
  0x52   :  { %623 = vmatpush3.bf16.msra.mxu0 %v665_v34  ;;  %v672_v34 = vld [vmem:[#allocation7 + $0x28] sm:$0xff]  }
  0x53   :  { %624 = vmatprep.subr.bf16.mxu0 %v666_v35  ;;  %640 = vmatprep.subr.bf16.mxu1 %v672_v34 }
  0x54   :  { %641 = vmatpush3.bf16.msra.mxu1 %v672_v34 }
  0x56   :  { %625 = vmatpush3.bf16.msra.mxu0 %v666_v35  ;;  %v673_v35 = vld [vmem:[#allocation7 + $0x30] sm:$0xff]  }
  0x57   :  { %642 = vmatprep.subr.bf16.mxu1 %v673_v35 }
  0x58   :  { %643 = vmatpush3.bf16.msra.mxu1 %v673_v35 }
  0xc5   :  { %v76_v7 = vpop.xlane.xlu0 %75  ;;  %v80_v8 = vpop.xlane.xlu1 %79 }
  0xc6   :  { %v83_v9 = vmul.f32 0.03125, %v76_v7  ;;  %v85_v10 = vmul.f32 0.03125, %v80_v8 }
  0xc8   :  { %v87_v13 = vsub.f32 %v60_v0, %v83_v9  ;;  %v89_v14 = vsub.f32 %v62_v1, %v85_v10 }
  0xc9   :  { %v78_v15 = vpop.xlane.xlu0 %77  ;;  %v82_v16 = vpop.xlane.xlu1 %81 }
  0xca   :  { %v84_v17 = vmul.f32 0.03125, %v78_v15  ;;  %v86_v18 = vmul.f32 0.03125, %v82_v16  ;;  %v91_v19 = vmul.f32 %v888_v12, %v87_v13  ;;  %v93_v20 = vmul.f32 %v888_v12, %v89_v14 }
  0xcc   :  { %v88_v21 = vsub.f32 %v61_v2, %v84_v17  ;;  %v90_v22 = vsub.f32 %v63_v3, %v86_v18  ;;  %v95_v23 = vmul.f32 %v91_v19, %v91_v19  ;;  %v97_v24 = vmul.f32 %v93_v20, %v93_v20 }
  0xce   :  { %99 = vadd.xlane.f32.xlu0 %v95_v23  ;;  %v92_v25 = vmul.f32 %v888_v12, %v88_v21  ;;  %v94_v26 = vmul.f32 %v888_v12, %v90_v22 }
  0xd0   :  { %v96_v27 = vmul.f32 %v92_v25, %v92_v25  ;;  %v98_v28 = vmul.f32 %v94_v26, %v94_v26 }
  0xd2   :  { %103 = vadd.xlane.f32.xlu0 %v97_v24  ;;  %101 = vadd.xlane.f32.xlu1 %v96_v27 }
  0xd6   :  { %105 = vadd.xlane.f32.xlu1 %v98_v28 }
 0x15b   :  { %v100_v36 = vpop.xlane.xlu0 %99 }
 0x15c   :  { %v107_v37 = vmul.f32 0.03125, %v100_v36  ;;  %v674_v36 = vld [vmem:[#allocation7 + $0x38] sm:$0xff]  }
 0x15d   :  { %644 = vmatprep.subr.bf16.mxu1 %v674_v36 }
 0x15e   :  { %v111_v38 = vadd.f32 1e-05, %v107_v37  ;;  %645 = vmatpush3.bf16.msra.mxu1 %v674_v36 }
 0x15f   :  { %v102_v39 = vpop.xlane.xlu1 %101  ;;  %v104_v40 = vpop.xlane.xlu0 %103 }
 0x160   :  { %675 = vrsqrt.f32 %v111_v38  ;;  %v108_v41 = vmul.f32 0.03125, %v102_v39  ;;  %v109_v42 = vmul.f32 0.03125, %v104_v40 }
 0x162   :  { %v112_v43 = vadd.f32 1e-05, %v108_v41  ;;  %v113_v44 = vadd.f32 1e-05, %v109_v42 }
 0x163   :  { %v106_v45 = vpop.xlane.xlu1 %105 }
 0x164   :  { %677 = vrsqrt.f32 %v112_v43  ;;  %v110_v46 = vmul.f32 0.03125, %v106_v45 }
 0x165   :  { %679 = vrsqrt.f32 %v113_v44 }
 0x166   :  { %v114_v47 = vadd.f32 1e-05, %v110_v46 }
 0x168   :  { %681 = vrsqrt.f32 %v114_v47 }
 0x16a   :  { %v676_v48 = vpop.eup %675 }
 0x16b   :  { %v119_v49 = vmul.f32 %v676_v48, %v91_v19 }
 0x16d   :  { %v127_v54 = vmul.f32 %v568_v50, %v119_v49 }
 0x16e   :  { %v678_v51 = vpop.eup %677 }
 0x16f   :  { %v680_v52 = vpop.eup %679  ;;  %v120_v53 = vmul.f32 %v678_v51, %v92_v25  ;;  %v900_v59 = vadd.f32 %v569_v55, %v127_v54 }
 0x170   :  { %v121_v56 = vmul.f32 %v680_v52, %v93_v20 }
 0x171   :  { %v128_v57 = vmul.f32 %v568_v50, %v120_v53  ;;  %v579_v53 = vld [vmem:[%s970_s3 + $0x3] ss:$0 sm:$0xff] }
 0x172   :  { %v682_v58 = vpop.eup %681  ;;  %v129_v62 = vmul.f32 %v568_v50, %v121_v56 }
 0x173   :  { %v902_v60 = vadd.f32 %v569_v55, %v128_v57  ;;  %v122_v61 = vmul.f32 %v682_v58, %v94_v26 }
 0x174   :  { %v906_v1 = vadd.f32 %v569_v55, %v129_v62 }
 0x175   :  { %v139_v63 = vpack.c.bf16 %v902_v60, %v900_v59  ;;  %v130_v0 = vmul.f32 %v568_v50, %v122_v61  ;;  %v578_v50 = vld [vmem:[%s970_s3 + $0x2] ss:$0 sm:$0xff] }
 0x177   :  { %626 = vmatprep.mubr.bf16.mxu0 %v139_v63  ;;  %v908_v2 = vadd.f32 %v569_v55, %v130_v0 }
 0x179   :  { %v140_v3 = vpack.c.bf16 %v908_v2, %v906_v1 }
 0x17b   :  { %627 = vmatmul.mubr.bf16.vlgmr.msra.gmra.mrb[0].mxu0 %v140_v3 }
 0x24e   :  { %v628_v4 = vpop.f32.mrb[0].mxu0 }
 0x24f   :  { %v239_v5 = vpop.f32.mrb[1].mxu0 }
 0x250   :  { %254 = vadd.xlane.f32.xlu0 %v239_v5  ;;  %v629_v6 = vpop.f32.mrb[2].mxu0 }
 0x251   :  { %v242_v7 = vpop.f32.mrb[3].mxu0 }
 0x252   :  { %256 = vadd.xlane.f32.xlu1 %v242_v7 }
 0x254   :  { %258 = vadd.xlane.f32.xlu0 %v628_v4 }
 0x256   :  { %260 = vadd.xlane.f32.xlu1 %v629_v6 }
 0x2dd   :  { %v255_v8 = vpop.xlane.xlu0 %254 }
 0x2de   :  { %v262_v9 = vmul.f32 0.03125, %v255_v8 }
 0x2df   :  { %v257_v10 = vpop.xlane.xlu1 %256 }
 0x2e0   :  { %v266_v11 = vsub.f32 %v239_v5, %v262_v9  ;;  %v263_v13 = vmul.f32 0.03125, %v257_v10 }
 0x2e1   :  { %v259_v14 = vpop.xlane.xlu0 %258 }
 0x2e2   :  { %v267_v15 = vsub.f32 %v242_v7, %v263_v13  ;;  %v264_v16 = vmul.f32 0.03125, %v259_v14  ;;  %v270_v17 = vmul.f32 %v888_v12, %v266_v11 }
 0x2e3   :  { %v261_v18 = vpop.xlane.xlu1 %260 }
 0x2e4   :  { %v268_v19 = vsub.f32 %v628_v4, %v264_v16  ;;  %v265_v20 = vmul.f32 0.03125, %v261_v18  ;;  %v274_v21 = vmul.f32 %v270_v17, %v270_v17  ;;  %v271_v22 = vmul.f32 %v888_v12, %v267_v15 }
 0x2e6   :  { %v269_v23 = vsub.f32 %v629_v6, %v265_v20  ;;  %278 = vadd.xlane.f32.xlu0 %v274_v21  ;;  %v275_v24 = vmul.f32 %v271_v22, %v271_v22  ;;  %v272_v25 = vmul.f32 %v888_v12, %v268_v19 }
 0x2e8   :  { %280 = vadd.xlane.f32.xlu1 %v275_v24  ;;  %v276_v26 = vmul.f32 %v272_v25, %v272_v25  ;;  %v273_v27 = vmul.f32 %v888_v12, %v269_v23 }
 0x2ea   :  { %282 = vadd.xlane.f32.xlu0 %v276_v26  ;;  %v277_v28 = vmul.f32 %v273_v27, %v273_v27 }
 0x2ec   :  { %284 = vadd.xlane.f32.xlu1 %v277_v28 }
 0x373   :  { %v279_v37 = vpop.xlane.xlu0 %278 }
 0x374   :  { %v286_v38 = vmul.f32 0.03125, %v279_v37 }
 0x375   :  { %v281_v39 = vpop.xlane.xlu1 %280 }
 0x376   :  { %v290_v40 = vadd.f32 1e-05, %v286_v38  ;;  %v287_v41 = vmul.f32 0.03125, %v281_v39 }
 0x377   :  { %v283_v42 = vpop.xlane.xlu0 %282 }
 0x378   :  { %683 = vrsqrt.f32 %v290_v40  ;;  %v291_v43 = vadd.f32 1e-05, %v287_v41  ;;  %v288_v44 = vmul.f32 0.03125, %v283_v42 }
 0x379   :  { %v285_v45 = vpop.xlane.xlu1 %284 }
 0x37a   :  { %685 = vrsqrt.f32 %v291_v43  ;;  %v292_v46 = vadd.f32 1e-05, %v288_v44  ;;  %v289_v47 = vmul.f32 0.03125, %v285_v45 }
 0x37c   :  { %687 = vrsqrt.f32 %v292_v46  ;;  %v293_v48 = vadd.f32 1e-05, %v289_v47 }
 0x37e   :  { %689 = vrsqrt.f32 %v293_v48 }
 0x382   :  { %v684_v49 = vpop.eup %683 }
 0x383   :  { %v298_v51 = vmul.f32 %v684_v49, %v270_v17 }
 0x384   :  { %v686_v52 = vpop.eup %685 }
 0x385   :  { %v299_v54 = vmul.f32 %v686_v52, %v271_v22  ;;  %v306_v55 = vmul.f32 %v578_v50, %v298_v51 }
 0x386   :  { %v688_v56 = vpop.eup %687 }
 0x387   :  { %v300_v57 = vmul.f32 %v688_v56, %v272_v25  ;;  %v307_v58 = vmul.f32 %v578_v50, %v299_v54  ;;  %v314_v61 = vadd.f32 %v579_v53, %v306_v55 }
 0x388   :  { %v690_v62 = vpop.eup %689 }
 0x389   :  { %v301_v63 = vmul.f32 %v690_v62, %v273_v27  ;;  %v315_v0 = vadd.f32 %v579_v53, %v307_v58  ;;  %v322_v3 = vmul.f32 0.70710677, %v314_v61  ;;  %v308_v4 = vmul.f32 %v578_v50, %v300_v57 }
 0x38a   :  { %v318_v13 = vmul.f32 0.5, %v314_v61 }
 0x38b   :  { %v323_v5 = vmul.f32 0.70710677, %v315_v0  ;;  %691 = verf.f32 %v322_v3  ;;  %v309_v6 = vmul.f32 %v578_v50, %v301_v63  ;;  %v316_v7 = vadd.f32 %v579_v53, %v308_v4 }
 0x38c   :  { %v319_v16 = vmul.f32 0.5, %v315_v0 }
 0x38d   :  { %693 = verf.f32 %v323_v5  ;;  %v317_v8 = vadd.f32 %v579_v53, %v309_v6  ;;  %v324_v9 = vmul.f32 0.70710677, %v316_v7  ;;  %v320_v22 = vmul.f32 0.5, %v316_v7  ;;  %v588_v6 = vld [vmem:[%s970_s3 + $0x4] ss:$0 sm:$0xff] }
 0x38f   :  { %v325_v10 = vmul.f32 0.70710677, %v317_v8  ;;  %695 = verf.f32 %v324_v9  ;;  %v321_v26 = vmul.f32 0.5, %v317_v8  ;;  %v589_v9 = vld [vmem:[%s970_s3 + $0x5] ss:$0 sm:$0xff]  ;;  %s817_s3 = smov [#allocation8]  }
 0x390   :  { %s554_s12 = sshll.u32 %s817_s3, 4  ;;  %s555_s12 = int_to_ptr.vmem [resolvable:$true] %s554_s12 }
 0x391   :  { %697 = verf.f32 %v325_v10  ;;  %s781_s14 = scalar_lea.vmem %s555_s12, 512  ;;  %p786_p11 = scmp.lt.s32.totalorder %s555_s12, %s555_s12 }
 0x392   :  { %p782_p10 = scmp.ne.s32.totalorder %s555_s12, %s781_s14  ;;  %p787_p12 = scmp.lt.s32.totalorder %s781_s14, %s781_s14 }
 0x394   :  { %p788_p13 = por %p787_p12, %p786_p11 }
 0x395   :  { %v692_v11 = vpop.eup %691 }
 0x396   :  { %v330_v14 = vadd.f32 1.0, %v692_v11  ;;  %p789_p0 = pnand %p788_p13, %p782_p10 }
 0x397   :  { %v694_v15 = vpop.eup %693 }
 0x398   :  { %v331_v17 = vadd.f32 1.0, %v694_v15  ;;  %v334_v18 = vmul.f32 %v330_v14, %v318_v13 }
 0x399   :  { %v696_v19 = vpop.eup %695 }
 0x39a   :  { %v335_v20 = vmul.f32 %v331_v17, %v319_v16  ;;  %v332_v23 = vadd.f32 1.0, %v696_v19  ;;  %v923_v24 = vadd.f32 %v334_v18, %v900_v59 }
 0x39b   :  { %v698_v21 = vpop.eup %697 }
 0x39c   :  { %v926_v25 = vadd.f32 %v335_v20, %v902_v60  ;;  %v333_v27 = vadd.f32 1.0, %v698_v21  ;;  %v336_v28 = vmul.f32 %v332_v23, %v320_v22 }
 0x39e   :  { %v342_v29 = vpack.c.bf16 %v926_v25, %v923_v24  ;;  %v337_v30 = vmul.f32 %v333_v27, %v321_v26  ;;  %v931_v31 = vadd.f32 %v336_v28, %v906_v1 }
 0x3a0   :  { %646 = vmatprep.mubr.bf16.mxu1 %v342_v29  ;;  %v934_v32 = vadd.f32 %v337_v30, %v908_v2 }
 0x3a2   :  { %v343_v59 = vpack.c.bf16 %v934_v32, %v931_v31 }
 0x3a4   :  { %647 = vmatmul.mubr.bf16.vlgmr.msra.gmra.mrb[0].mxu1 %v343_v59 }
 0x477   :  { %v648_v60 = vpop.f32.mrb[0].mxu1 }
 0x478   :  { %v442_v33 = vpop.f32.mrb[1].mxu1 }
 0x479   :  { %457 = vadd.xlane.f32.xlu0 %v442_v33  ;;  %v649_v34 = vpop.f32.mrb[2].mxu1 }
 0x47a   :  { %v445_v35 = vpop.f32.mrb[3].mxu1 }
 0x47b   :  { %459 = vadd.xlane.f32.xlu1 %v445_v35 }
 0x47d   :  { %461 = vadd.xlane.f32.xlu0 %v648_v60 }
 0x47f   :  { %463 = vadd.xlane.f32.xlu1 %v649_v34 }
 0x506   :  { %v458_v36 = vpop.xlane.xlu0 %457 }
 0x507   :  { %v465_v37 = vmul.f32 0.03125, %v458_v36 }
 0x508   :  { %v460_v38 = vpop.xlane.xlu1 %459 }
 0x509   :  { %v469_v1 = vsub.f32 %v442_v33, %v465_v37  ;;  %v466_v39 = vmul.f32 0.03125, %v460_v38 }
 0x50a   :  { %v462_v40 = vpop.xlane.xlu0 %461 }
 0x50b   :  { %v470_v2 = vsub.f32 %v445_v35, %v466_v39  ;;  %v467_v41 = vmul.f32 0.03125, %v462_v40  ;;  %v473_v42 = vmul.f32 %v888_v12, %v469_v1 }
 0x50c   :  { %v464_v43 = vpop.xlane.xlu1 %463 }
 0x50d   :  { %v471_v44 = vsub.f32 %v648_v60, %v467_v41  ;;  %v468_v45 = vmul.f32 0.03125, %v464_v43  ;;  %v477_v46 = vmul.f32 %v473_v42, %v473_v42  ;;  %v474_v47 = vmul.f32 %v888_v12, %v470_v2 }
 0x50f   :  { %v472_v48 = vsub.f32 %v649_v34, %v468_v45  ;;  %481 = vadd.xlane.f32.xlu0 %v477_v46  ;;  %v478_v49 = vmul.f32 %v474_v47, %v474_v47  ;;  %v475_v50 = vmul.f32 %v888_v12, %v471_v44 }
 0x511   :  { %483 = vadd.xlane.f32.xlu1 %v478_v49  ;;  %v479_v51 = vmul.f32 %v475_v50, %v475_v50  ;;  %v476_v52 = vmul.f32 %v888_v12, %v472_v48 }
 0x513   :  { %485 = vadd.xlane.f32.xlu0 %v479_v51  ;;  %v480_v53 = vmul.f32 %v476_v52, %v476_v52 }
 0x515   :  { %487 = vadd.xlane.f32.xlu1 %v480_v53 }
 0x59c   :  { %v482_v54 = vpop.xlane.xlu0 %481 }
 0x59d   :  { %v489_v55 = vmul.f32 0.03125, %v482_v54 }
 0x59e   :  { %v484_v56 = vpop.xlane.xlu1 %483 }
 0x59f   :  { %v493_v57 = vadd.f32 1e-05, %v489_v55  ;;  %v490_v58 = vmul.f32 0.03125, %v484_v56 }
 0x5a0   :  { %v486_v61 = vpop.xlane.xlu0 %485 }
 0x5a1   :  { %699 = vrsqrt.f32 %v493_v57  ;;  %v494_v62 = vadd.f32 1e-05, %v490_v58  ;;  %v491_v63 = vmul.f32 0.03125, %v486_v61 }
 0x5a2   :  { %v488_v0 = vpop.xlane.xlu1 %487 }
 0x5a3   :  { %701 = vrsqrt.f32 %v494_v62  ;;  %v495_v3 = vadd.f32 1e-05, %v491_v63  ;;  %v492_v4 = vmul.f32 0.03125, %v488_v0 }
 0x5a5   :  { %703 = vrsqrt.f32 %v495_v3  ;;  %v496_v5 = vadd.f32 1e-05, %v492_v4 }
 0x5a7   :  { %705 = vrsqrt.f32 %v496_v5 }
 0x5ab   :  { %v700_v12 = vpop.eup %699 }
 0x5ac   :  { %v501_v7 = vmul.f32 %v700_v12, %v473_v42 }
 0x5ad   :  { %v702_v8 = vpop.eup %701 }
 0x5ae   :  { %v509_v10 = vmul.f32 %v588_v6, %v501_v7  ;;  %v502_v11 = vmul.f32 %v702_v8, %v474_v47 }
 0x5af   :  { %v704_v13 = vpop.eup %703 }
 0x5b0   :  { %v510_v14 = vmul.f32 %v588_v6, %v502_v11  ;;  %v503_v15 = vmul.f32 %v704_v13, %v475_v50  ;;  %v517_v16 = vadd.f32 %v589_v9, %v509_v10 }
 0x5b1   :  { %v706_v17 = vpop.eup %705 }
 0x5b2   :  { %v511_v18 = vmul.f32 %v588_v6, %v503_v15  ;;  %v504_v19 = vmul.f32 %v706_v17, %v476_v52  ;;  %v518_v20 = vadd.f32 %v589_v9, %v510_v14  ;;  %v525_v21 = vmul.f32 0.70710677, %v517_v16 }
 0x5b3   :  { %v521_v60 = vmul.f32 0.5, %v517_v16 }
 0x5b4   :  { %v519_v22 = vadd.f32 %v589_v9, %v511_v18  ;;  %v512_v23 = vmul.f32 %v588_v6, %v504_v19  ;;  %v526_v26 = vmul.f32 0.70710677, %v518_v20  ;;  %707 = verf.f32 %v525_v21 }
 0x5b5   :  { %v522_v34 = vmul.f32 0.5, %v518_v20 }
 0x5b6   :  { %v520_v27 = vadd.f32 %v589_v9, %v512_v23  ;;  %v527_v28 = vmul.f32 0.70710677, %v519_v22  ;;  %709 = verf.f32 %v526_v26  ;;  %v523_v38 = vmul.f32 0.5, %v519_v22 }
 0x5b8   :  { %v528_v29 = vmul.f32 0.70710677, %v520_v27  ;;  %711 = verf.f32 %v527_v28  ;;  %v524_v41 = vmul.f32 0.5, %v520_v27 }
 0x5ba   :  { %713 = verf.f32 %v528_v29 }
 0x5be   :  { %v708_v30 = vpop.eup %707 }
 0x5bf   :  { %v533_v33 = vadd.f32 1.0, %v708_v30 }
 0x5c0   :  { %v710_v59 = vpop.eup %709 }
 0x5c1   :  { %v534_v35 = vadd.f32 1.0, %v710_v59  ;;  %v537_v37 = vmul.f32 %v533_v33, %v521_v60 }
 0x5c2   :  { %v712_v36 = vpop.eup %711 }
 0x5c3   :  { %v535_v1 = vadd.f32 1.0, %v712_v36  ;;  %v538_v39 = vmul.f32 %v534_v35, %v522_v34  ;;  %v541_v2 = vadd.f32 %v537_v37, %v923_v24 }
 0x5c4   :  { %v714_v40 = vpop.eup %713 }
 0x5c5   :  { %v536_v42 = vadd.f32 1.0, %v714_v40  ;;  %v539_v43 = vmul.f32 %v535_v1, %v523_v38  ;;  %v542_v44 = vadd.f32 %v538_v39, %v926_v25  ;;  %545 = vst [vmem:[#allocation8] sm:$0xff] %v541_v2 }
 0x5c7   :  { %v540_v45 = vmul.f32 %v536_v42, %v524_v41  ;;  %v543_v46 = vadd.f32 %v539_v43, %v931_v31  ;;  %546 = vst [vmem:[#allocation8 + $0x8] sm:$0xff] %v542_v44 }
 0x5c9   :  { %v544_v47 = vadd.f32 %v540_v45, %v934_v32  ;;  %547 = vst [vmem:[#allocation8 + $0x10] sm:$0xff] %v543_v46 }
 0x5cb   :  { %548 = vst [vmem:[#allocation8 + $0x18] sm:$0xff] %v544_v47 }
 0x5cc   :  { %792 = shalt.err (!%p789_p0)
}
 0x5cd   :  { %s793_s17 = scalar_lea.hbm %s971_s4, 512 }
 0x5ce   :  { %p794_p1 = scmp.ne.s32.totalorder %s971_s4, %s793_s17  ;;  %p797_p2 = scmp.lt.u32.totalorder %s793_s17, %s971_s4 }
 0x5d0   :  { %p799_p3 = pnand %p797_p2, %p794_p1 }
 0x5d2   :  { %802 = shalt.err (!%p799_p3)
}
 0x5d3   :  { %560 = dma.vmem_to_hbm [thread:$0]  %s555_s12, 512, %s971_s4, [#allocation4], %s813_s1, %s813_s1, %s814_s13  }
 0x5d4   :  { %807 = dma.done.wait [#allocation4], 512  }
 0x5d5   :  { %808 = vsyncadd [#allocation4], 4294966784 }
 0x5d6   :  { %564 = vsyncpa [#allocation3], 1 }
 0x5d7   :  { %565 = vsyncpa [#allocation6], 1 }
 0x5d8   :  { %566 = vsyncpa [#allocation4], 1 }

</bundles_post_ra>
